<compile_context>
chip_gen: v5e
topology: v5e:2x2
jax: 0.10.0
libtpu: 0.0.40
codegen_flags: <defaults>
</compile_context>

<pallas_src>
import functools

import jax
import jax.numpy as jnp
from jax.experimental import pallas as pl
from jax.experimental.pallas import tpu as pltpu

LANE = 128
BF16_SUBLANE = 16          # one bf16 vreg holds [16, 128]
MAX_BATCH_TILE = 256       # MXU height on v6e/v7x; fine on v5e too

# Fixed activation-quantizer constants from the PyTorch module.
IN_MAX = 1.0
HID_MAX = 1.61
OUT_MAX = 1.33
POST_SCALE = 1.0           # ScalarBiasScale scale init
POST_BIAS = 0.33           # ScalarBiasScale bias init (last layer)
IN_SHIFT = -0.25           # ScalarBiasScale(scale=False, bias_init=-0.25) on the input
BN_EPS = 1e-5


def _round_up(n, m):
    return ((n + m - 1) // m) * m


# ----------------------------- quant constants & integer fake-quant ------------

def _signed_consts(bits, max_val):
    n = 2 ** (bits - 1)
    return n, max_val / n, n / max_val          # (half_levels, step, inv_step)


def _unsigned_consts(bits, max_val):
    levels = 2 ** bits - 1
    return levels, max_val / levels, levels / max_val


def _fq_signed_code(z, bits):
    # z is already scaled by inv_step; return the integer code.
    n = 2 ** (bits - 1)
    return jnp.clip(jnp.round(z), -n, n - 1)


def _fq_unsigned_code(z, bits):
    levels = 2 ** bits - 1
    return jnp.clip(jnp.round(z), 0, levels)


# ----------------------------- fused whole-model kernel ------------------------

def make_fused_mlp_kernel(n_layers, in_bits, hid_bits, out_bits,
                          in_mul, in_add, out_value_scale, out_value_bias):
    """One kernel for the whole MLP (per batch tile).

    Ref order: x, (w_0, b_0), ..., (w_{L-1}, b_{L-1}), out.
    Quantizer step / inv-step constants are pre-folded into w/b; the values carried
    between layers are integer codes (exact in bf16).
    """
    def kernel(*refs):
        x_ref = refs[0]
        o_ref = refs[-1]
        wb_refs = refs[1:-1]

        # input: (BN_in + ScalarBias(-0.25) + quant inv_step) folded into two scalars,
        # then signed fake-quant -> integer codes in [-2^(b-1), 2^(b-1)-1]
        q = _fq_signed_code(x_ref[...] * in_mul + in_add, in_bits)

        for li in range(n_layers):                      # unrolled at trace time
            w_ref = wb_refs[2 * li]
            b_ref = wb_refs[2 * li + 1]
            # BN, bias, prev step and current inv_step already folded; bf16 MXU, f32 acc
            z = jnp.dot(q.astype(jnp.bfloat16), w_ref[...],
                        preferred_element_type=jnp.float32) + b_ref[...]
            if li < n_layers - 1:
                q = _fq_unsigned_code(z, hid_bits)       # QuantReLU(hidden, 1.61) code
            else:
                q = _fq_signed_code(z, out_bits)         # QuantHardTanh(out, 1.33) code
                # de-quant + ScalarBiasScale(bias=0.33); store bf16 (lane-dense, unmasked)
                o_ref[...] = (q * out_value_scale + out_value_bias).astype(o_ref.dtype)
    return kernel


# ----------------------------- parameter construction --------------------------

def random_fixed_sparsity_mask(key, in_features, out_features, fan_in):
    """fan_in ones per output row, shape (out_features, in_features)."""
    u = jax.random.uniform(key, (out_features, in_features))
    idx = jnp.argsort(u, axis=1)[:, :fan_in]
    mask = jnp.zeros((out_features, in_features), jnp.float32)
    mask = mask.at[jnp.arange(out_features)[:, None], idx].set(1.0)
    return mask


def init_linear(key, in_features, out_features):
    kw, kb = jax.random.split(key)
    bound = 1.0 / float(in_features) ** 0.5
    w = jax.random.uniform(kw, (out_features, in_features), jnp.float32, -bound, bound)
    b = jax.random.uniform(kb, (out_features,), jnp.float32, -bound, bound)
    return w, b


def build_model_params(key, model_config):
    """Synthetic params matching MnistNeqModel.__init__ shapes, with eval-mode BN,
    linear bias, and all quantizer step constants folded into lane-padded bf16 weights."""
    num_neurons = ([model_config["input_length"]]
                   + model_config["hidden_layers"]
                   + [model_config["output_length"]])
    bn_scale_val = float(1.0 / (1.0 + BN_EPS) ** 0.5)   # gamma=1, beta=0, running (0,1)
    bn_shift_val = 0.0

    in_bits = model_config["input_bitwidth"]
    hid_bits = model_config["hidden_bitwidth"]
    out_bits = model_config["output_bitwidth"]
    _, step_in, _ = _signed_consts(in_bits, IN_MAX)
    _, step_hid, inv_step_hid = _unsigned_consts(hid_bits, HID_MAX)
    _, _, inv_step_out = _signed_consts(out_bits, OUT_MAX)

    n_layers = len(num_neurons) - 1
    layers = []
    for i in range(1, len(num_neurons)):
        in_f, out_f = num_neurons[i - 1], num_neurons[i]
        in_pad, out_pad = _round_up(in_f, LANE), _round_up(out_f, LANE)
        key, km, kl = jax.random.split(key, 3)
        if i == 1:
            fan_in = model_config["input_fanin"]
        elif i == n_layers:
            fan_in = model_config["output_fanin"]
        else:
            fan_in = model_config["hidden_fanin"]
        mask = random_fixed_sparsity_mask(km, in_f, out_f, fan_in)
        w, b = init_linear(kl, in_f, out_f)

        step_prev = step_in if i == 1 else step_hid
        inv_step_cur = inv_step_out if i == n_layers else inv_step_hid
        # mask -> fold output-side BN (column scale) -> fold prev-step & current inv-step
        w_eff = (w * mask).T * (bn_scale_val * step_prev * inv_step_cur)   # (in_f, out_f)
        b_eff = (b * bn_scale_val + bn_shift_val) * inv_step_cur           # (out_f,)
        w_pad = jnp.zeros((in_pad, out_pad), jnp.float32).at[:in_f, :out_f].set(w_eff)
        b_pad = jnp.zeros((1, out_pad), jnp.float32).at[:, :out_f].set(b_eff)
        layers.append({"w": w_pad.astype(jnp.bfloat16), "b": b_pad})
    return {"layers": layers}


# ----------------------------- forward pass -------------------------------------

def make_forward(params, model_config):
    n_layers = len(params["layers"])
    in_bits = model_config["input_bitwidth"]
    hid_bits = model_config["hidden_bitwidth"]
    out_bits = model_config["output_bitwidth"]

    bn_scale_val = float(1.0 / (1.0 + BN_EPS) ** 0.5)
    _, _, inv_step_in = _signed_consts(in_bits, IN_MAX)
    _, step_out, _ = _signed_consts(out_bits, OUT_MAX)
    in_mul = bn_scale_val * inv_step_in          # folds input BN + quant inv_step
    in_add = IN_SHIFT * inv_step_in              # folds ScalarBias(-0.25)
    out_value_scale = step_out * POST_SCALE
    out_value_bias = POST_BIAS

    kernel = make_fused_mlp_kernel(n_layers, in_bits, hid_bits, out_bits,
                                   in_mul, in_add, out_value_scale, out_value_bias)

    flat = []
    for p in params["layers"]:
        flat += [p["w"], p["b"]]
    in_padded = params["layers"][0]["w"].shape[0]
    out_padded = params["layers"][-1]["w"].shape[1]
    out_f = model_config["output_length"]

    weight_bytes = sum(int(p["w"].size) * 2 + int(p["b"].size) * 4
                       for p in params["layers"])
    flops_per_row = sum(2 * int(p["w"].shape[0]) * int(p["w"].shape[1])
                        for p in params["layers"])

    @jax.jit
    def fwd(x):
        batch = x.shape[0]
        # batch tile: multiple of 16 (bf16 sublane packing), capped at MXU height
        tb = min(MAX_BATCH_TILE, _round_up(batch, BF16_SUBLANE))
        batch_pad = _round_up(batch, tb)
        grid = (batch_pad // tb,)

        x_pad = jnp.zeros((batch_pad, in_padded), jnp.float32)
        x_pad = x_pad.at[:batch, :x.shape[1]].set(x)

        in_specs = [pl.BlockSpec((tb, in_padded), lambda i: (i, 0))]
        for p in params["layers"]:
            # full-shape blocks, constant index_map: fetched once, VMEM-resident
            in_specs.append(pl.BlockSpec(p["w"].shape, lambda i: (0, 0)))
            in_specs.append(pl.BlockSpec(p["b"].shape, lambda i: (0, 0)))
        out_specs = pl.BlockSpec((tb, out_padded), lambda i: (i, 0))

        cost = pl.CostEstimate(
            flops=batch_pad * flops_per_row,
            transcendentals=0,
            bytes_accessed=batch_pad * in_padded * 4
                           + batch_pad * out_padded * 2
                           + weight_bytes,
        )

        y_pad = pl.pallas_call(
            kernel,
            out_shape=jax.ShapeDtypeStruct((batch_pad, out_padded), jnp.bfloat16),
            grid=grid,
            in_specs=in_specs,
            out_specs=out_specs,
            compiler_params=pltpu.CompilerParams(
                dimension_semantics=("parallel",)),
            cost_estimate=cost,
        )(x_pad, *flat)
        return y_pad[:batch, :out_f]

    return fwd


# ----------------------------- pure-JAX reference --------------------------------

def mnist_neq_reference(x, params, model_config):
    """Same folded math as the fused kernel, in plain JAX (for correctness check)."""
    in_bits = model_config["input_bitwidth"]
    hid_bits = model_config["hidden_bitwidth"]
    out_bits = model_config["output_bitwidth"]
    bn_scale_val = float(1.0 / (1.0 + BN_EPS) ** 0.5)
    _, _, inv_step_in = _signed_consts(in_bits, IN_MAX)
    _, step_out, _ = _signed_consts(out_bits, OUT_MAX)

    in_padded = params["layers"][0]["w"].shape[0]
    batch = x.shape[0]
    x_pad = jnp.zeros((batch, in_padded), jnp.float32).at[:, :x.shape[1]].set(x)

    q = _fq_signed_code(x_pad * (bn_scale_val * inv_step_in) + IN_SHIFT * inv_step_in,
                        in_bits)
    n = len(params["layers"])
    out = None
    for li, p in enumerate(params["layers"]):
        z = jnp.dot(q.astype(jnp.bfloat16), p["w"],
                    preferred_element_type=jnp.float32) + p["b"]
        if li < n - 1:
            q = _fq_unsigned_code(z, hid_bits)
        else:
            q = _fq_signed_code(z, out_bits)
            out = (q * (step_out * POST_SCALE) + POST_BIAS).astype(jnp.bfloat16)
    return out[:, :model_config["output_length"]]


# ----------------------------- main ----------------------------------------------

if __name__ == "__main__":
    model_config = {
        "input_length": 128,
        "hidden_layers": [64, 64],
        "output_length": 16,
        "input_bitwidth": 2,
        "hidden_bitwidth": 2,
        "output_bitwidth": 2,
        "input_fanin": 6,
        "hidden_fanin": 6,
        "output_fanin": 6,
        "input_dropout": 0.0,
    }

    key = jax.random.PRNGKey(0)
    kx, kx2, kp = jax.random.split(key, 3)

    params = build_model_params(kp, model_config)
    fwd = make_forward(params, model_config)
    ref = jax.jit(functools.partial(
        mnist_neq_reference, params=params, model_config=model_config))

    # small batch (single tile)
    x_small = jax.random.uniform(kx, (8, model_config["input_length"]),
                                 jnp.float32, minval=-1.0, maxval=1.0)
    y = fwd(x_small)
    jax.block_until_ready(y)
    y_ref = ref(x_small)
    jax.block_until_ready(y_ref)
    assert y.shape == (8, model_config["output_length"])
    assert jnp.all(jnp.isfinite(y.astype(jnp.float32)))
    assert float(jnp.max(jnp.abs(y.astype(jnp.float32)
                                 - y_ref.astype(jnp.float32)))) < 1e-2

    # larger batch (exercises the multi-tile grid / pipelining path)
    x_big = jax.random.uniform(kx2, (512, model_config["input_length"]),
                               jnp.float32, minval=-1.0, maxval=1.0)
    y_big = fwd(x_big)
    jax.block_until_ready(y_big)
    y_big_ref = ref(x_big)
    jax.block_until_ready(y_big_ref)
    assert y_big.shape == (512, model_config["output_length"])
    assert float(jnp.max(jnp.abs(y_big.astype(jnp.float32)
                                 - y_big_ref.astype(jnp.float32)))) < 1e-2

    print("KERNEL_OK")
</pallas_src>

<mosaic_0001>
module attributes {stable_mosaic.version = 11 : i64} {
  func.func @kernel(%arg0: i32, %arg1: memref<16x128xf32, #tpu.memory_space<vmem>>, %arg2: memref<128x128xbf16, #tpu.memory_space<vmem>>, %arg3: memref<1x128xf32, #tpu.memory_space<vmem>>, %arg4: memref<128x128xbf16, #tpu.memory_space<vmem>>, %arg5: memref<1x128xf32, #tpu.memory_space<vmem>>, %arg6: memref<128x128xbf16, #tpu.memory_space<vmem>>, %arg7: memref<1x128xf32, #tpu.memory_space<vmem>>, %arg8: memref<16x128xbf16, #tpu.memory_space<vmem>>) attributes {dimension_semantics = [#tpu.dimension_semantics<parallel>], iteration_bounds = array<i64: 1>, scalar_prefetch = 0 : i64, scratch_operands = 0 : i64, tpu.core_type = #tpu.core_type<tc>, window_params = [{transform_indices = @transform_0, window_bounds = array<i64: 16, 128>}, {pipeline_mode = #tpu.pipeline_mode<synchronous>, transform_indices = @transform_1, window_bounds = array<i64: 128, 128>}, {pipeline_mode = #tpu.pipeline_mode<synchronous>, transform_indices = @transform_2, window_bounds = array<i64: 1, 128>}, {pipeline_mode = #tpu.pipeline_mode<synchronous>, transform_indices = @transform_3, window_bounds = array<i64: 128, 128>}, {pipeline_mode = #tpu.pipeline_mode<synchronous>, transform_indices = @transform_4, window_bounds = array<i64: 1, 128>}, {pipeline_mode = #tpu.pipeline_mode<synchronous>, transform_indices = @transform_5, window_bounds = array<i64: 128, 128>}, {pipeline_mode = #tpu.pipeline_mode<synchronous>, transform_indices = @transform_6, window_bounds = array<i64: 1, 128>}, {transform_indices = @transform_7, window_bounds = array<i64: 16, 128>}]} {
    %c0 = arith.constant 0 : index
    %c0_0 = arith.constant 0 : index
    %0 = vector.load %arg1[%c0, %c0_0] : memref<16x128xf32, #tpu.memory_space<vmem>>, vector<16x128xf32>
    %cst = arith.constant 1.999990e+00 : f32
    %1 = vector.broadcast %cst : f32 to vector<16x128xf32>
    %2 = arith.mulf %0, %1 : vector<16x128xf32>
    %cst_1 = arith.constant -5.000000e-01 : f32
    %3 = vector.broadcast %cst_1 : f32 to vector<16x128xf32>
    %4 = arith.addf %2, %3 : vector<16x128xf32>
    %5 = math.roundeven %4 : vector<16x128xf32>
    %c-2_i32 = arith.constant -2 : i32
    %c1_i32 = arith.constant 1 : i32
    %6 = arith.sitofp %c-2_i32 : i32 to f32
    %7 = vector.broadcast %6 : f32 to vector<16x128xf32>
    %8 = arith.maximumf %7, %5 : vector<16x128xf32>
    %9 = arith.sitofp %c1_i32 : i32 to f32
    %10 = vector.broadcast %9 : f32 to vector<16x128xf32>
    %11 = arith.minimumf %10, %8 : vector<16x128xf32>
    %12 = arith.truncf %11 : vector<16x128xf32> to vector<16x128xbf16>
    %c0_2 = arith.constant 0 : index
    %c0_3 = arith.constant 0 : index
    %13 = vector.load %arg2[%c0_2, %c0_3] : memref<128x128xbf16, #tpu.memory_space<vmem>>, vector<128x128xbf16>
    %cst_4 = arith.constant dense<0.000000e+00> : vector<16x128xf32>
    %14 = tpu.matmul %12, %13, %cst_4 {dimension_numbers = #tpu.dot_dimension_numbers<[1], [0], [0], [1], [0, 0, 1, 1], [], []>} : vector<16x128xbf16>, vector<128x128xbf16>, vector<16x128xf32> -> vector<16x128xf32>
    %c0_5 = arith.constant 0 : index
    %c0_6 = arith.constant 0 : index
    %15 = vector.load %arg3[%c0_5, %c0_6] : memref<1x128xf32, #tpu.memory_space<vmem>>, vector<1x128xf32>
    %16 = vector.broadcast %15 : vector<1x128xf32> to vector<16x128xf32>
    %17 = arith.addf %14, %16 : vector<16x128xf32>
    %18 = math.roundeven %17 : vector<16x128xf32>
    %c0_i32 = arith.constant 0 : i32
    %c3_i32 = arith.constant 3 : i32
    %19 = arith.sitofp %c0_i32 : i32 to f32
    %20 = vector.broadcast %19 : f32 to vector<16x128xf32>
    %21 = arith.maximumf %20, %18 : vector<16x128xf32>
    %22 = arith.sitofp %c3_i32 : i32 to f32
    %23 = vector.broadcast %22 : f32 to vector<16x128xf32>
    %24 = arith.minimumf %23, %21 : vector<16x128xf32>
    %25 = arith.truncf %24 : vector<16x128xf32> to vector<16x128xbf16>
    %c0_7 = arith.constant 0 : index
    %c0_8 = arith.constant 0 : index
    %26 = vector.load %arg4[%c0_7, %c0_8] : memref<128x128xbf16, #tpu.memory_space<vmem>>, vector<128x128xbf16>
    %cst_9 = arith.constant dense<0.000000e+00> : vector<16x128xf32>
    %27 = tpu.matmul %25, %26, %cst_9 {dimension_numbers = #tpu.dot_dimension_numbers<[1], [0], [0], [1], [0, 0, 1, 1], [], []>} : vector<16x128xbf16>, vector<128x128xbf16>, vector<16x128xf32> -> vector<16x128xf32>
    %c0_10 = arith.constant 0 : index
    %c0_11 = arith.constant 0 : index
    %28 = vector.load %arg5[%c0_10, %c0_11] : memref<1x128xf32, #tpu.memory_space<vmem>>, vector<1x128xf32>
    %29 = vector.broadcast %28 : vector<1x128xf32> to vector<16x128xf32>
    %30 = arith.addf %27, %29 : vector<16x128xf32>
    %31 = math.roundeven %30 : vector<16x128xf32>
    %c0_i32_12 = arith.constant 0 : i32
    %c3_i32_13 = arith.constant 3 : i32
    %32 = arith.sitofp %c0_i32_12 : i32 to f32
    %33 = vector.broadcast %32 : f32 to vector<16x128xf32>
    %34 = arith.maximumf %33, %31 : vector<16x128xf32>
    %35 = arith.sitofp %c3_i32_13 : i32 to f32
    %36 = vector.broadcast %35 : f32 to vector<16x128xf32>
    %37 = arith.minimumf %36, %34 : vector<16x128xf32>
    %38 = arith.truncf %37 : vector<16x128xf32> to vector<16x128xbf16>
    %c0_14 = arith.constant 0 : index
    %c0_15 = arith.constant 0 : index
    %39 = vector.load %arg6[%c0_14, %c0_15] : memref<128x128xbf16, #tpu.memory_space<vmem>>, vector<128x128xbf16>
    %cst_16 = arith.constant dense<0.000000e+00> : vector<16x128xf32>
    %40 = tpu.matmul %38, %39, %cst_16 {dimension_numbers = #tpu.dot_dimension_numbers<[1], [0], [0], [1], [0, 0, 1, 1], [], []>} : vector<16x128xbf16>, vector<128x128xbf16>, vector<16x128xf32> -> vector<16x128xf32>
    %c0_17 = arith.constant 0 : index
    %c0_18 = arith.constant 0 : index
    %41 = vector.load %arg7[%c0_17, %c0_18] : memref<1x128xf32, #tpu.memory_space<vmem>>, vector<1x128xf32>
    %42 = vector.broadcast %41 : vector<1x128xf32> to vector<16x128xf32>
    %43 = arith.addf %40, %42 : vector<16x128xf32>
    %44 = math.roundeven %43 : vector<16x128xf32>
    %c-2_i32_19 = arith.constant -2 : i32
    %c1_i32_20 = arith.constant 1 : i32
    %45 = arith.sitofp %c-2_i32_19 : i32 to f32
    %46 = vector.broadcast %45 : f32 to vector<16x128xf32>
    %47 = arith.maximumf %46, %44 : vector<16x128xf32>
    %48 = arith.sitofp %c1_i32_20 : i32 to f32
    %49 = vector.broadcast %48 : f32 to vector<16x128xf32>
    %50 = arith.minimumf %49, %47 : vector<16x128xf32>
    %cst_21 = arith.constant 6.650000e-01 : f32
    %51 = vector.broadcast %cst_21 : f32 to vector<16x128xf32>
    %52 = arith.mulf %50, %51 : vector<16x128xf32>
    %cst_22 = arith.constant 3.300000e-01 : f32
    %53 = vector.broadcast %cst_22 : f32 to vector<16x128xf32>
    %54 = arith.addf %52, %53 : vector<16x128xf32>
    %55 = arith.truncf %54 : vector<16x128xf32> to vector<16x128xbf16>
    %c0_23 = arith.constant 0 : index
    %c0_24 = arith.constant 0 : index
    %56 = vector.load %arg8[%c0_23, %c0_24] : memref<16x128xbf16, #tpu.memory_space<vmem>>, vector<16x128xbf16>
    tpu.vector_store %arg8[%c0_23, %c0_24], %55 {strides = array<i32>} : memref<16x128xbf16, #tpu.memory_space<vmem>>, vector<16x128xbf16>,
    return
  }
  func.func @transform_0(%arg0: i32) -> (i32, i32) {
    %c0_i32 = arith.constant 0 : i32
    %c0_i32_0 = arith.constant 0 : i32
    return %arg0, %c0_i32 : i32, i32
  }
  func.func @transform_1(%arg0: i32) -> (i32, i32) {
    %c0_i32 = arith.constant 0 : i32
    %c0_i32_0 = arith.constant 0 : i32
    %c0_i32_1 = arith.constant 0 : i32
    return %c0_i32, %c0_i32_0 : i32, i32
  }
  func.func @transform_2(%arg0: i32) -> (i32, i32) {
    %c0_i32 = arith.constant 0 : i32
    %c0_i32_0 = arith.constant 0 : i32
    %c0_i32_1 = arith.constant 0 : i32
    return %c0_i32, %c0_i32_0 : i32, i32
  }
  func.func @transform_3(%arg0: i32) -> (i32, i32) {
    %c0_i32 = arith.constant 0 : i32
    %c0_i32_0 = arith.constant 0 : i32
    %c0_i32_1 = arith.constant 0 : i32
    return %c0_i32, %c0_i32_0 : i32, i32
  }
  func.func @transform_4(%arg0: i32) -> (i32, i32) {
    %c0_i32 = arith.constant 0 : i32
    %c0_i32_0 = arith.constant 0 : i32
    %c0_i32_1 = arith.constant 0 : i32
    return %c0_i32, %c0_i32_0 : i32, i32
  }
  func.func @transform_5(%arg0: i32) -> (i32, i32) {
    %c0_i32 = arith.constant 0 : i32
    %c0_i32_0 = arith.constant 0 : i32
    %c0_i32_1 = arith.constant 0 : i32
    return %c0_i32, %c0_i32_0 : i32, i32
  }
  func.func @transform_6(%arg0: i32) -> (i32, i32) {
    %c0_i32 = arith.constant 0 : i32
    %c0_i32_0 = arith.constant 0 : i32
    %c0_i32_1 = arith.constant 0 : i32
    return %c0_i32, %c0_i32_0 : i32, i32
  }
  func.func @transform_7(%arg0: i32) -> (i32, i32) {
    %c0_i32 = arith.constant 0 : i32
    %c0_i32_0 = arith.constant 0 : i32
    return %arg0, %c0_i32 : i32, i32
  }
}

</mosaic_0001>

<bundles_post_ra>
// kernel: fwd.1
= control target key start
LH: loop header
LB: loop body
LE: loop exit
PB: predicated region body
PF: predicated region fallthrough
CT: control target
= control target key end

     0   :  { %12 = vsyncpa [#allocation3], 0  ;;  %s711_s0 = inlined_call_operand.vmem [shape: f32[16,128], index: 0, kind: input, shape index: {}]   ;;  %s712_s1 = inlined_call_operand.hbm [shape: bf16[128,128], index: 1, kind: input, shape index: {}]   ;;  %s713_s2 = inlined_call_operand.vmem [shape: f32[1,128], index: 2, kind: input, shape index: {}]   ;;  %s714_s3 = inlined_call_operand.hbm [shape: bf16[128,128], index: 3, kind: input, shape index: {}]   ;;  %s715_s4 = inlined_call_operand.vmem [shape: f32[1,128], index: 4, kind: input, shape index: {}]   ;;  %s716_s5 = inlined_call_operand.hbm [shape: bf16[128,128], index: 5, kind: input, shape index: {}]   ;;  %s717_s6 = inlined_call_operand.vmem [shape: f32[1,128], index: 6, kind: input, shape index: {}]   ;;  %s718_s7 = inlined_call_operand.vmem [shape: bf16[16,128], index: 7, kind: output, shape index: {}]  }
   0x1   :  { %13 = vsyncpa [#allocation5], 0  ;;  %s35_s26 = sshll.u32 %s714_s3, 4  ;;  %s639_s27 = smov [#allocation4]   ;;  %s36_s26 = int_to_ptr.hbm [resolvable:$true] %s35_s26 }
   0x2   :  { %s37_s28 = sshll.u32 %s639_s27, 4  ;;  %s20_s8 = sshll.u32 %s712_s1, 4  ;;  %s38_s28 = int_to_ptr.vmem [resolvable:$true] %s37_s28  ;;  %s21_s8 = int_to_ptr.hbm [resolvable:$true] %s20_s8 }
   0x3   :  { %s640_s9 = smov 64   ;;  %s641_s10 = smov 4  }
   0x4   :  { %43 = dma.hbm_to_vmem [thread:$0]  %s36_s26, 1024, %s38_s28, [#allocation5], %s640_s9, %s640_s9, %s641_s10  }
   0x5   :  { %s642_s11 = smov [#allocation2]   ;;  %s50_s15 = sshll.u32 %s716_s5, 4  ;;  %s51_s15 = int_to_ptr.hbm [resolvable:$true] %s50_s15 }
   0x6   :  { %s22_s12 = sshll.u32 %s642_s11, 4  ;;  %s643_s3 = smov [#allocation6]   ;;  %s23_s12 = int_to_ptr.vmem [resolvable:$true] %s22_s12 }
   0x7   :  { %28 = dma.hbm_to_vmem [thread:$0]  %s21_s8, 1024, %s23_s12, [#allocation3], %s640_s9, %s640_s9, %s641_s10  }
   0x8   :  { %s52_s16 = sshll.u32 %s643_s3, 4  ;;  %s53_s16 = int_to_ptr.vmem [resolvable:$true] %s52_s16 }
   0x9   :  { %58 = dma.hbm_to_vmem [thread:$0]  %s51_s15, 1024, %s53_s16, [#allocation5], %s640_s9, %s640_s9, %s641_s10  }
   0xa   :  { %635 = dma.done.wait [#allocation3], 1024  }
   0xb   :  { %636 = vsyncadd [#allocation3], 4294966272 }
   0xc   :  { %637 = dma.done.wait [#allocation5], 2048  }
   0xd   :  { %638 = vsyncadd [#allocation5], 4294965248  ;;  %v469_v0 = vld [vmem:[#allocation2 + $0x38] sm:$0xff]  ;;  %v468_v1 = vld [vmem:[#allocation2 + $0x30] sm:$0xff] }
   0xe   :  { %154 = vmatpush.bf16.msra.mxu0 %v469_v0  ;;  %v73_v2 = vld [vmem:[%s711_s0] sm:$0xff]  ;;  %v74_v3 = vld [vmem:[%s711_s0 + $0x8] sm:$0xff]  ;;  %v477_v5 = vld [vmem:[#allocation4 + $0x38] sm:$0xff] }
   0xf   :  { %v75_v4 = vmul.f32 1.99999, %v73_v2  ;;  %v76_v6 = vmul.f32 1.99999, %v74_v3  ;;  %243 = vmatpush.bf16.msra.mxu1 %v477_v5  ;;  %v476_v8 = vld [vmem:[#allocation4 + $0x30] sm:$0xff]  ;;  %v467_v9 = vld [vmem:[#allocation2 + $0x28] sm:$0xff] }
  0x10   :  { %v466_v14 = vld [vmem:[#allocation2 + $0x20] sm:$0xff]  ;;  %v465_v22 = vld [vmem:[#allocation2 + $0x18] sm:$0xff]  ;;  %v464_v25 = vld [vmem:[#allocation2 + $0x10] sm:$0xff] }
  0x11   :  { %v77_v7 = vadd.f32 -0.5, %v75_v4  ;;  %v78_v10 = vadd.f32 -0.5, %v76_v6  ;;  %v463_v30 = vld [vmem:[#allocation2 + $0x8] sm:$0xff]  ;;  %v462_v33 = vld [vmem:[#allocation2] sm:$0xff]  ;;  %v473_v37 = vld [vmem:[#allocation4 + $0x18] sm:$0xff] }
  0x12   :  { %155 = vmatpush.bf16.msra.mxu0 %v468_v1  ;;  %v475_v35 = vld [vmem:[#allocation4 + $0x28] sm:$0xff]  ;;  %v474_v36 = vld [vmem:[#allocation4 + $0x20] sm:$0xff]  ;;  %v472_v38 = vld [vmem:[#allocation4 + $0x10] sm:$0xff] }
  0x13   :  { %v493_v11 = vcvt.f32.s32 %v77_v7  ;;  %v501_v12 = vcvt.f32.s32 %v78_v10  ;;  %244 = vmatpush.bf16.msra.mxu1 %v476_v8  ;;  %v496_v15 = vand.u32 2147483648, %v77_v7  ;;  %v504_v17 = vand.u32 2147483648, %v78_v10  ;;  %v471_v39 = vld [vmem:[#allocation4 + $0x8] sm:$0xff]  ;;  %v470_v40 = vld [vmem:[#allocation4] sm:$0xff]  ;;  %v485_v41 = vld [vmem:[#allocation6 + $0x38] sm:$0xff] }
  0x14   :  { %v491_v18 = vand.u32 2147483647, %v77_v7  ;;  %v499_v20 = vand.u32 2147483647, %v78_v10  ;;  %332 = vmatpush.bf16.msra.mxu2 %v485_v41  ;;  %v484_v42 = vld [vmem:[#allocation6 + $0x30] sm:$0xff]  ;;  %v483_v3 = vld [vmem:[#allocation6 + $0x28] sm:$0xff] }
  0x15   :  { %v494_v13 = vcvt.s32.f32 %v493_v11  ;;  %v502_v16 = vcvt.s32.f32 %v501_v12  ;;  %v560_v43 = vld [vmem:[%s713_s2] ss:$0 sm:$0xff]  ;;  %v481_v5 = vld [vmem:[#allocation6 + $0x18] sm:$0xff]  ;;  %v480_v6 = vld [vmem:[#allocation6 + $0x10] sm:$0xff] }
  0x16   :  { %156 = vmatpush.bf16.msra.mxu0 %v467_v9  ;;  %vm492_vm0 = vcmp.lt.f32.partialorder %v491_v18, 8388608.0  ;;  %vm500_vm1 = vcmp.lt.f32.partialorder %v499_v20, 8388608.0  ;;  %v482_v4 = vld [vmem:[#allocation6 + $0x20] sm:$0xff] }
  0x17   :  { %v495_v19 = vand.u32 2147483647, %v494_v13  ;;  %v503_v21 = vand.u32 2147483647, %v502_v16  ;;  %245 = vmatpush.bf16.msra.mxu1 %v475_v35  ;;  %v478_v8 = vld [vmem:[#allocation6] sm:$0xff] }
  0x18   :  { %333 = vmatpush.bf16.msra.mxu2 %v484_v42  ;;  %v561_v9 = vld [vmem:[%s715_s4] ss:$0 sm:$0xff] }
  0x19   :  { %v497_v23 = vor.u32 %v496_v15, %v495_v19  ;;  %v505_v24 = vor.u32 %v504_v17, %v503_v21 }
  0x1a   :  { %157 = vmatpush.bf16.msra.mxu0 %v466_v14 }
  0x1b   :  { %v498_v26 = vsel %vm492_vm0, %v497_v23, %v77_v7  ;;  %v506_v27 = vsel %vm500_vm1, %v505_v24, %v78_v10  ;;  %246 = vmatpush.bf16.msra.mxu1 %v474_v36  ;;  %v479_v7 = vld [vmem:[#allocation6 + $0x8] sm:$0xff] }
  0x1c   :  { %v81_v28 = vmax.f32 %v498_v26, -2.0  ;;  %v82_v29 = vmax.f32 %v506_v27, -2.0  ;;  %334 = vmatpush.bf16.msra.mxu2 %v483_v3 }
  0x1e   :  { %158 = vmatpush.bf16.msra.mxu0 %v465_v22  ;;  %v83_v31 = vmin.f32 %v81_v28, 1.0  ;;  %v84_v32 = vmin.f32 %v82_v29, 1.0 }
  0x1f   :  { %247 = vmatpush.bf16.msra.mxu1 %v473_v37 }
  0x20   :  { %v85_v34 = vpack.c.bf16 %v84_v32, %v83_v31  ;;  %335 = vmatpush.bf16.msra.mxu2 %v482_v4 }
  0x22   :  { %159 = vmatpush.bf16.msra.mxu0 %v464_v25 }
  0x23   :  { %248 = vmatpush.bf16.msra.mxu1 %v472_v38 }
  0x24   :  { %336 = vmatpush.bf16.msra.mxu2 %v481_v5 }
  0x26   :  { %160 = vmatpush.bf16.msra.mxu0 %v463_v30 }
  0x27   :  { %249 = vmatpush.bf16.msra.mxu1 %v471_v39 }
  0x28   :  { %337 = vmatpush.bf16.msra.mxu2 %v480_v6 }
  0x2a   :  { %161 = vmatpush.bf16.msra.mxu0 %v462_v33  ;;  %v562_v33 = vld [vmem:[%s717_s6] ss:$0 sm:$0xff] }
  0x2b   :  { %250 = vmatpush.bf16.msra.mxu1 %v470_v40 }
  0x2c   :  { %338 = vmatpush.bf16.msra.mxu2 %v479_v7 }
  0x2d   :  { %162 = vmatmul.bf16.vlgmr.msra.gmra.mxu0 %v85_v34 }
  0x30   :  { %339 = vmatpush.bf16.msra.mxu2 %v478_v8 }
  0xaa   :  { %v163_v44 = vpop.f32.mrf.mxu0 }
  0xab   :  { %v164_v45 = vadd.f32 %v560_v43, %v163_v44 }
  0xad   :  { %v509_v46 = vcvt.f32.s32 %v164_v45  ;;  %v512_v50 = vand.u32 2147483648, %v164_v45  ;;  %v507_v52 = vand.u32 2147483647, %v164_v45 }
  0xaf   :  { %v510_v47 = vcvt.s32.f32 %v509_v46  ;;  %vm508_vm2 = vcmp.lt.f32.partialorder %v507_v52, 8388608.0 }
  0xb1   :  { %v511_v48 = vand.u32 2147483647, %v510_v47 }
  0xb2   :  { %v165_v49 = vpop.f32.mrf.mxu0 }
  0xb3   :  { %v166_v51 = vadd.f32 %v560_v43, %v165_v49  ;;  %v513_v54 = vor.u32 %v512_v50, %v511_v48 }
  0xb5   :  { %v517_v53 = vcvt.f32.s32 %v166_v51  ;;  %v515_v56 = vand.u32 2147483647, %v166_v51  ;;  %v520_v58 = vand.u32 2147483648, %v166_v51  ;;  %v514_v59 = vsel %vm508_vm2, %v513_v54, %v164_v45 }
  0xb6   :  { %v170_v61 = vmax.f32 %v514_v59, 0.0 }
  0xb7   :  { %v518_v55 = vcvt.s32.f32 %v517_v53  ;;  %vm516_vm3 = vcmp.lt.f32.partialorder %v515_v56, 8388608.0 }
  0xb8   :  { %v172_v0 = vmin.f32 %v170_v61, 3.0 }
  0xb9   :  { %v519_v57 = vand.u32 2147483647, %v518_v55 }
  0xbb   :  { %v521_v60 = vor.u32 %v520_v58, %v519_v57 }
  0xbd   :  { %v522_v62 = vsel %vm516_vm3, %v521_v60, %v166_v51 }
  0xbe   :  { %v171_v63 = vmax.f32 %v522_v62, 0.0 }
  0xc0   :  { %v173_v1 = vmin.f32 %v171_v63, 3.0 }
  0xc2   :  { %v174_v2 = vpack.c.bf16 %v173_v1, %v172_v0 }
  0xc4   :  { %251 = vmatmul.bf16.vlgmr.msra.gmra.mxu1 %v174_v2 }
 0x141   :  { %v252_v10 = vpop.f32.mrf.mxu1 }
 0x142   :  { %v253_v11 = vadd.f32 %v561_v9, %v252_v10 }
 0x144   :  { %v525_v12 = vcvt.f32.s32 %v253_v11  ;;  %v528_v16 = vand.u32 2147483648, %v253_v11  ;;  %v523_v18 = vand.u32 2147483647, %v253_v11 }
 0x146   :  { %v526_v13 = vcvt.s32.f32 %v525_v12  ;;  %vm524_vm4 = vcmp.lt.f32.partialorder %v523_v18, 8388608.0 }
 0x148   :  { %v527_v14 = vand.u32 2147483647, %v526_v13 }
 0x149   :  { %v254_v15 = vpop.f32.mrf.mxu1 }
 0x14a   :  { %v255_v17 = vadd.f32 %v561_v9, %v254_v15  ;;  %v529_v20 = vor.u32 %v528_v16, %v527_v14 }
 0x14c   :  { %v533_v19 = vcvt.f32.s32 %v255_v17  ;;  %v531_v22 = vand.u32 2147483647, %v255_v17  ;;  %v536_v24 = vand.u32 2147483648, %v255_v17  ;;  %v530_v25 = vsel %vm524_vm4, %v529_v20, %v253_v11 }
 0x14d   :  { %v259_v27 = vmax.f32 %v530_v25, 0.0 }
 0x14e   :  { %v534_v21 = vcvt.s32.f32 %v533_v19  ;;  %vm532_vm5 = vcmp.lt.f32.partialorder %v531_v22, 8388608.0 }
 0x14f   :  { %v261_v30 = vmin.f32 %v259_v27, 3.0 }
 0x150   :  { %v535_v23 = vand.u32 2147483647, %v534_v21 }
 0x152   :  { %v537_v26 = vor.u32 %v536_v24, %v535_v23 }
 0x154   :  { %v538_v28 = vsel %vm532_vm5, %v537_v26, %v255_v17 }
 0x155   :  { %v260_v29 = vmax.f32 %v538_v28, 0.0 }
 0x157   :  { %v262_v31 = vmin.f32 %v260_v29, 3.0 }
 0x159   :  { %v263_v32 = vpack.c.bf16 %v262_v31, %v261_v30 }
 0x15b   :  { %340 = vmatmul.bf16.vlgmr.msra.gmra.mxu2 %v263_v32 }
 0x1de   :  { %v341_v34 = vpop.f32.mrf.mxu2 }
 0x1df   :  { %v342_v35 = vadd.f32 %v562_v33, %v341_v34 }
 0x1e1   :  { %v541_v36 = vcvt.f32.s32 %v342_v35  ;;  %v539_v38 = vand.u32 2147483647, %v342_v35  ;;  %v544_v40 = vand.u32 2147483648, %v342_v35 }
 0x1e3   :  { %v542_v37 = vcvt.s32.f32 %v541_v36  ;;  %vm540_vm6 = vcmp.lt.f32.partialorder %v539_v38, 8388608.0 }
 0x1e5   :  { %v543_v39 = vand.u32 2147483647, %v542_v37 }
 0x1e6   :  { %v343_v41 = vpop.f32.mrf.mxu2 }
 0x1e7   :  { %v545_v42 = vor.u32 %v544_v40, %v543_v39  ;;  %v344_v43 = vadd.f32 %v562_v33, %v343_v41 }
 0x1e9   :  { %v546_v44 = vsel %vm540_vm6, %v545_v42, %v342_v35  ;;  %v549_v45 = vcvt.f32.s32 %v344_v43  ;;  %v547_v48 = vand.u32 2147483647, %v344_v43  ;;  %v552_v50 = vand.u32 2147483648, %v344_v43 }
 0x1ea   :  { %v348_v47 = vmax.f32 %v546_v44, -2.0 }
 0x1eb   :  { %v550_v46 = vcvt.s32.f32 %v549_v45  ;;  %vm548_vm7 = vcmp.lt.f32.partialorder %v547_v48, 8388608.0 }
 0x1ec   :  { %v350_v52 = vmin.f32 %v348_v47, 1.0 }
 0x1ed   :  { %v551_v49 = vand.u32 2147483647, %v550_v46 }
 0x1ee   :  { %v352_v55 = vmul.f32 0.665, %v350_v52 }
 0x1ef   :  { %v553_v51 = vor.u32 %v552_v50, %v551_v49 }
 0x1f0   :  { %v354_v58 = vadd.f32 0.33, %v352_v55 }
 0x1f1   :  { %v554_v53 = vsel %vm548_vm7, %v553_v51, %v344_v43 }
 0x1f2   :  { %v349_v54 = vmax.f32 %v554_v53, -2.0 }
 0x1f4   :  { %v351_v56 = vmin.f32 %v349_v54, 1.0 }
 0x1f6   :  { %v353_v57 = vmul.f32 0.665, %v351_v56 }
 0x1f8   :  { %v355_v59 = vadd.f32 0.33, %v353_v57 }
 0x1fa   :  { %v489_v60 = vpack.c.bf16 %v355_v59, %v354_v58 }
 0x1fc   :  { %490 = vst [vmem:[%s718_s7] sm:$0xff] %v489_v60  }
 0x1fd   :  { %364 = vsyncpa [#allocation3], 1 }
 0x1fe   :  { %365 = vsyncpa [#allocation5], 1 }

</bundles_post_ra>
